<compile_context>
chip_gen: v7x
topology: tpu7x:2x2x1
jax: 0.10.0
libtpu: 0.0.40
codegen_flags: <defaults>
</compile_context>

<pallas_src>
import jax
import jax.numpy as jnp
from jax.experimental import pallas as pl
from jax.experimental.pallas import tpu as pltpu

M_PLUS = 0.9
M_MINUS = 0.1
LOSS_LAMBDA = 0.5

_LANES = 128
_DEFAULT_TILE_BYTES = 4 * 1024 * 1024   # ~4 MiB f32-equivalent per input per grid step
_SMALL_N_THRESHOLD = 256 * 1024         # below this, one fused XLA kernel wins
_VMEM_LIMIT_BYTES = 32 * 1024 * 1024


def _cdiv(a, b):
    return -(-a // b)


def _round_up(a, b):
    return _cdiv(a, b) * b


def _sublane_packing(dtype):
    # f32 -> 1 (8,128), bf16/f16 -> 2 (16,128), int8/fp8 -> 4 (32,128)
    return max(1, 4 // jnp.dtype(dtype).itemsize)


# ----------------------------------------------------------------------------
# Reference (also used as the small-input fast path: one fused XLA kernel).
# ----------------------------------------------------------------------------
def margin_loss_ref(score, target):
    score = score.astype(jnp.float32)
    target = target.astype(jnp.float32)
    max_left = jnp.maximum(M_PLUS - score, 0.0) ** 2
    max_right = jnp.maximum(score - M_MINUS, 0.0) ** 2
    l_c = target * max_left + LOSS_LAMBDA * (1.0 - target) * max_right
    return jnp.sum(l_c)


# ----------------------------------------------------------------------------
# Dense-target kernel: lane-dense (rows, sub, 128) slabs of score and target.
# ----------------------------------------------------------------------------
def _make_margin_loss_kernel(rows_total, tile_rows):
    ragged = (rows_total % tile_rows) != 0

    def kernel(score_ref, target_ref, out_ref):
        s = score_ref[...]
        t = target_ref[...]
        if s.dtype != jnp.float32:
            s = s.astype(jnp.float32)
        if t.dtype != jnp.float32:
            t = t.astype(jnp.float32)

        max_left = jnp.maximum(M_PLUS - s, 0.0)
        max_left = max_left * max_left                     # (0.9 - s)_+^2
        max_right = jnp.maximum(s - M_MINUS, 0.0)
        half_right = LOSS_LAMBDA * max_right * max_right   # 0.5 * (s - 0.1)_+^2
        # t*L + 0.5*(1-t)*R  ==  t*(L - 0.5*R) + 0.5*R   (fewer VALU ops)
        l_c = t * (max_left - half_right) + half_right

        if ragged:
            # The final tile's trailing row-groups read past the array
            # (unspecified data) -- zero them before reducing.  This branch is
            # elided at trace time when the grid divides evenly; the select is
            # ~free anyway (kernel is HBM-bound with >=1.75x VALU headroom).
            row = (jax.lax.broadcasted_iota(jnp.int32, (l_c.shape[0], 1, 1), 0)
                   + pl.program_id(0) * tile_rows)
            l_c = jnp.where(row < rows_total, l_c, 0.0)

        # Per-tile partial: reduce only the leading axis -> (sub, 128).  The
        # single tiny cross-lane reduce happens once, outside the kernel.
        out_ref[0] = jnp.sum(l_c, axis=0)

    return kernel


def _as_slab(x, n, padded, rows, sub):
    """Flatten to 1D, pad by at most one (sub,128) row-group, view as slab."""
    flat = jnp.ravel(x)
    if padded != n:
        # Pad values (score=0, target=0) contribute exactly 0 to the loss:
        #   target=0 -> l_c = 0.5 * max(0 - 0.1, 0)^2 = 0.
        # When n is already a multiple of sub*128 this is skipped entirely --
        # no full-array HBM copy.
        flat = jnp.pad(flat, (0, padded - n))
    return flat.reshape(rows, sub, _LANES)


def margin_loss(score, target, *, tile_bytes=_DEFAULT_TILE_BYTES, force_pallas=False):
    """Capsule-net margin loss for dense (B, C) score/target arrays -> scalar f32."""
    assert score.shape == target.shape, (score.shape, target.shape)
    n = 1
    for d in score.shape:
        n *= d
    if n == 0:
        return jnp.zeros((), jnp.float32)
    if (not force_pallas) and n < _SMALL_N_THRESHOLD:
        # Typical capsule-net shapes: launch + layout plumbing would dominate;
        # let XLA fuse the whole thing.
        return margin_loss_ref(score, target)

    # dtype-dependent sublane count so bf16 / int8 inputs use native tiles.
    packing = max(_sublane_packing(score.dtype), _sublane_packing(target.dtype))
    sub = 8 * packing
    row_elems = sub * _LANES

    rows_total = _cdiv(n, row_elems)
    padded = rows_total * row_elems

    score_l = _as_slab(score, n, padded, rows_total, sub)
    target_l = _as_slab(target, n, padded, rows_total, sub)

    # ~tile_bytes of f32-equivalent data per input per grid step, then shrink
    # so the grid has >= ~4 steps when possible (v7x megacore needs >= 2).
    tile_rows = max(1, tile_bytes // (row_elems * 4))
    tile_rows = min(tile_rows, max(1, _cdiv(rows_total, 4)))
    num_tiles = _cdiv(rows_total, tile_rows)

    kernel = _make_margin_loss_kernel(rows_total=rows_total, tile_rows=tile_rows)

    partials = pl.pallas_call(
        kernel,
        out_shape=jax.ShapeDtypeStruct((num_tiles, sub, _LANES), jnp.float32),
        grid_spec=pltpu.PrefetchScalarGridSpec(
            num_scalar_prefetch=0,
            grid=(num_tiles,),
            in_specs=[
                pl.BlockSpec((tile_rows, sub, _LANES), lambda i: (i, 0, 0)),
                pl.BlockSpec((tile_rows, sub, _LANES), lambda i: (i, 0, 0)),
            ],
            out_specs=pl.BlockSpec((1, sub, _LANES), lambda i: (i, 0, 0)),
        ),
        compiler_params=pltpu.CompilerParams(
            dimension_semantics=("parallel",),
            vmem_limit_bytes=_VMEM_LIMIT_BYTES,
        ),
    )(score_l, target_l)

    # Final tiny cross-lane reduce of the (num_tiles, sub, 128) partials.
    return jnp.sum(partials)


# ----------------------------------------------------------------------------
# One-hot / integer-label fast path: ~half the HBM bytes of the dense path.
# ----------------------------------------------------------------------------
def _make_onehot_kernel(batch, num_classes, tile_b):
    ragged = (batch % tile_b) != 0

    def kernel(score_ref, labels_ref, out_ref):
        s = score_ref[...]                                   # (tile_b, C)
        if s.dtype != jnp.float32:
            s = s.astype(jnp.float32)
        lab = labels_ref[...]                                # (tile_b, 1) int32

        cls = jax.lax.broadcasted_iota(jnp.int32, (tile_b, num_classes), 1)
        t = (cls == lab).astype(jnp.float32)                 # one-hot built in-kernel

        max_left = jnp.maximum(M_PLUS - s, 0.0)
        max_left = max_left * max_left
        max_right = jnp.maximum(s - M_MINUS, 0.0)
        half_right = LOSS_LAMBDA * max_right * max_right
        l_c = t * (max_left - half_right) + half_right

        if ragged:
            row = (jax.lax.broadcasted_iota(jnp.int32, (tile_b, 1), 0)
                   + pl.program_id(0) * tile_b)
            l_c = jnp.where(row < batch, l_c, 0.0)

        # Per-tile partial packed into an (8, C) block: real sum in sublane 0,
        # zeros elsewhere (summed away outside the kernel).
        part = jnp.sum(l_c, axis=0, keepdims=True)           # (1, C)
        subl = jax.lax.broadcasted_iota(jnp.int32, (8, num_classes), 0)
        out_ref[0] = jnp.where(subl == 0, part, 0.0)

    return kernel


def margin_loss_onehot(score, labels, *, tile_bytes=_DEFAULT_TILE_BYTES,
                       force_pallas=False):
    """Margin loss with integer class labels: target[b, c] = (labels[b] == c)."""
    B, C = score.shape
    n = B * C
    if n == 0:
        return jnp.zeros((), jnp.float32)
    if (not force_pallas) and n < _SMALL_N_THRESHOLD:
        return margin_loss_ref(score, jax.nn.one_hot(labels, C, dtype=jnp.float32))

    # Batch tile: ~tile_bytes of f32 scores per grid step, multiple of 8 (or
    # the full batch), shrunk so the grid has >= ~4 steps for v7x megacore.
    tile_b = max(8, (tile_bytes // (C * 4)) // 8 * 8)
    if B <= tile_b:
        tile_b = B                      # block equals full batch dim (always legal)
    else:
        tile_b = min(tile_b, max(8, _round_up(_cdiv(B, 4), 8)))
    num_tiles = _cdiv(B, tile_b)

    labels2d = labels.reshape(B, 1).astype(jnp.int32)
    kernel = _make_onehot_kernel(batch=B, num_classes=C, tile_b=tile_b)

    partials = pl.pallas_call(
        kernel,
        out_shape=jax.ShapeDtypeStruct((num_tiles, 8, C), jnp.float32),
        grid_spec=pltpu.PrefetchScalarGridSpec(
            num_scalar_prefetch=0,
            grid=(num_tiles,),
            in_specs=[
                pl.BlockSpec((tile_b, C), lambda i: (i, 0)),
                pl.BlockSpec((tile_b, 1), lambda i: (i, 0)),
            ],
            out_specs=pl.BlockSpec((1, 8, C), lambda i: (i, 0, 0)),
        ),
        compiler_params=pltpu.CompilerParams(
            dimension_semantics=("parallel",),
            vmem_limit_bytes=_VMEM_LIMIT_BYTES,
        ),
    )(score, labels2d)

    return jnp.sum(partials)


if __name__ == "__main__":
    key = jax.random.PRNGKey(0)
    B, C = 8, 16  # small shapes consistent with a capsule-net classifier head

    k_score, k_label = jax.random.split(key)
    score = jax.random.uniform(k_score, (B, C), dtype=jnp.float32)  # capsule lengths in [0,1]
    labels = jax.random.randint(k_label, (B,), 0, C)
    target = jax.nn.one_hot(labels, C, dtype=jnp.float32)

    ref = jax.block_until_ready(margin_loss_ref(score, target))

    # Dense-target Pallas kernel (force the Pallas path at this small shape).
    loss_dense = jax.block_until_ready(margin_loss(score, target, force_pallas=True))
    # One-hot / integer-label Pallas fast path.
    loss_onehot = jax.block_until_ready(margin_loss_onehot(score, labels, force_pallas=True))
    # Default dispatch (small input -> single fused XLA kernel).
    loss_auto = jax.block_until_ready(margin_loss(score, target))

    assert jnp.allclose(loss_dense, ref, rtol=1e-5, atol=1e-5), (loss_dense, ref)
    assert jnp.allclose(loss_onehot, ref, rtol=1e-5, atol=1e-5), (loss_onehot, ref)
    assert jnp.allclose(loss_auto, ref, rtol=1e-5, atol=1e-5), (loss_auto, ref)
    print("KERNEL_OK")
</pallas_src>

<mosaic_0001>
module attributes {stable_mosaic.version = 11 : i64} {
  func.func @kernel(%arg0: i32, %arg1: memref<1x8x128xf32, #tpu.memory_space<vmem>>, %arg2: memref<1x8x128xf32, #tpu.memory_space<vmem>>, %arg3: memref<1x8x128xf32, #tpu.memory_space<vmem>>) attributes {dimension_semantics = [#tpu.dimension_semantics<parallel>], iteration_bounds = array<i64: 1>, scalar_prefetch = 0 : i64, scratch_operands = 0 : i64, tpu.core_type = #tpu.core_type<tc>, window_params = [{transform_indices = @transform_0, window_bounds = array<i64: 1, 8, 128>}, {transform_indices = @transform_1, window_bounds = array<i64: 1, 8, 128>}, {transform_indices = @transform_2, window_bounds = array<i64: 1, 8, 128>}]} {
    %c0 = arith.constant 0 : index
    %c0_0 = arith.constant 0 : index
    %c0_1 = arith.constant 0 : index
    %0 = vector.load %arg1[%c0, %c0_0, %c0_1] : memref<1x8x128xf32, #tpu.memory_space<vmem>>, vector<1x8x128xf32>
    %c0_2 = arith.constant 0 : index
    %c0_3 = arith.constant 0 : index
    %c0_4 = arith.constant 0 : index
    %1 = vector.load %arg2[%c0_2, %c0_3, %c0_4] : memref<1x8x128xf32, #tpu.memory_space<vmem>>, vector<1x8x128xf32>
    %cst = arith.constant 0.899999976 : f32
    %2 = vector.broadcast %cst : f32 to vector<1x8x128xf32>
    %3 = arith.subf %2, %0 : vector<1x8x128xf32>
    %cst_5 = arith.constant 0.000000e+00 : f32
    %4 = vector.broadcast %cst_5 : f32 to vector<1x8x128xf32>
    %5 = arith.maximumf %3, %4 : vector<1x8x128xf32>
    %6 = arith.mulf %5, %5 : vector<1x8x128xf32>
    %cst_6 = arith.constant 1.000000e-01 : f32
    %7 = vector.broadcast %cst_6 : f32 to vector<1x8x128xf32>
    %8 = arith.subf %0, %7 : vector<1x8x128xf32>
    %cst_7 = arith.constant 0.000000e+00 : f32
    %9 = vector.broadcast %cst_7 : f32 to vector<1x8x128xf32>
    %10 = arith.maximumf %8, %9 : vector<1x8x128xf32>
    %cst_8 = arith.constant 5.000000e-01 : f32
    %11 = vector.broadcast %cst_8 : f32 to vector<1x8x128xf32>
    %12 = arith.mulf %11, %10 : vector<1x8x128xf32>
    %13 = arith.mulf %12, %10 : vector<1x8x128xf32>
    %14 = arith.subf %6, %13 : vector<1x8x128xf32>
    %15 = arith.mulf %1, %14 : vector<1x8x128xf32>
    %16 = arith.addf %15, %13 : vector<1x8x128xf32>
    %cst_9 = arith.constant dense<0.000000e+00> : vector<8x128xf32>
    %17 = vector.multi_reduction <add>, %16, %cst_9 [0] : vector<1x8x128xf32> to vector<8x128xf32>
    %c0_10 = arith.constant 0 : index
    %c0_11 = arith.constant 0 : index
    %c0_12 = arith.constant 0 : index
    %18 = vector.load %arg3[%c0_10, %c0_11, %c0_12] : memref<1x8x128xf32, #tpu.memory_space<vmem>>, vector<1x8x128xf32>
    %19 = vector.shape_cast %18 : vector<1x8x128xf32> to vector<8x128xf32>
    %20 = vector.shape_cast %17 : vector<8x128xf32> to vector<1x8x128xf32>
    tpu.vector_store %arg3[%c0_10, %c0_11, %c0_12], %20 {strides = array<i32>} : memref<1x8x128xf32, #tpu.memory_space<vmem>>, vector<1x8x128xf32>,
    return
  }
  func.func @transform_0(%arg0: i32) -> (i32, i32, i32) {
    %c0_i32 = arith.constant 0 : i32
    %c0_i32_0 = arith.constant 0 : i32
    %c0_i32_1 = arith.constant 0 : i32
    return %arg0, %c0_i32, %c0_i32_0 : i32, i32, i32
  }
  func.func @transform_1(%arg0: i32) -> (i32, i32, i32) {
    %c0_i32 = arith.constant 0 : i32
    %c0_i32_0 = arith.constant 0 : i32
    %c0_i32_1 = arith.constant 0 : i32
    return %arg0, %c0_i32, %c0_i32_0 : i32, i32, i32
  }
  func.func @transform_2(%arg0: i32) -> (i32, i32, i32) {
    %c0_i32 = arith.constant 0 : i32
    %c0_i32_0 = arith.constant 0 : i32
    %c0_i32_1 = arith.constant 0 : i32
    return %arg0, %c0_i32, %c0_i32_0 : i32, i32, i32
  }
}

</mosaic_0001>

<bundles_post_ra>
// kernel: tpu_custom_call.1
= control target key start
LH: loop header
LB: loop body
LE: loop exit
PB: predicated region body
PF: predicated region fallthrough
CT: control target
= control target key end

     0   :  { %7 = vsyncpa [#allocation3], 0  ;;  %s196_s0 = inlined_call_operand.hbm [shape: f32[1,8,128], index: 0, kind: input, shape index: {}]   ;;  %s197_s1 = inlined_call_operand.hbm [shape: f32[1,8,128], index: 1, kind: input, shape index: {}]   ;;  %s198_s2 = inlined_call_operand.hbm [shape: f32[1,8,128], index: 2, kind: output, shape index: {}]  }
   0x1   :  { %8 = vsyncpa [#allocation6], 0 }
   0x2   :  { %9 = vsyncpa [#allocation4], 0  ;;  %s142_s9 = smov [#allocation2]   ;;  %s143_s11 = smov [#allocation5]  }
   0x3   :  { %s16_s10 = sshll.u32 %s142_s9, 4  ;;  %s26_s12 = sshll.u32 %s143_s11, 4  ;;  %s17_s10 = int_to_ptr.vmem [resolvable:$true] %s16_s10  ;;  %s27_s12 = int_to_ptr.vmem [resolvable:$true] %s26_s12 }
   0x4   :  { %s70_s15 = scalar_lea.hbm %s196_s0, 128 }
   0x5   :  { %p71_p0 = scmp.ne.s32.totalorder %s196_s0, %s70_s15  ;;  %p74_p1 = scmp.lt.u32.totalorder %s70_s15, %s196_s0 }
   0x7   :  { %p76_p2 = pnand %p74_p1, %p71_p0 }
   0x9   :  { %79 = shalt.err (!%p76_p2)
}
   0xa   :  { %s80_s20 = scalar_lea.vmem %s17_s10, 128  ;;  %p85_p4 = scmp.lt.s32.totalorder %s17_s10, %s17_s10 }
   0xb   :  { %p81_p3 = scmp.ne.s32.totalorder %s17_s10, %s80_s20  ;;  %p86_p5 = scmp.lt.s32.totalorder %s80_s20, %s80_s20 }
   0xd   :  { %p87_p6 = por %p86_p5, %p85_p4 }
   0xf   :  { %p88_p7 = pnand %p87_p6, %p81_p3 }
  0x11   :  { %91 = shalt.err (!%p88_p7)
}
  0x12   :  { %19 = dma.hbm_to_vmem [thread:$0]  %s196_s0, 128, %s17_s10, [#allocation3]  }
  0x13   :  { %s92_s25 = scalar_lea.hbm %s197_s1, 128 }
  0x14   :  { %p93_p8 = scmp.ne.s32.totalorder %s197_s1, %s92_s25  ;;  %p96_p9 = scmp.lt.u32.totalorder %s92_s25, %s197_s1 }
  0x16   :  { %p98_p10 = pnand %p96_p9, %p93_p8 }
  0x18   :  { %101 = shalt.err (!%p98_p10)
}
  0x19   :  { %s102_s30 = scalar_lea.vmem %s27_s12, 128  ;;  %p107_p12 = scmp.lt.s32.totalorder %s27_s12, %s27_s12 }
  0x1a   :  { %p103_p11 = scmp.ne.s32.totalorder %s27_s12, %s102_s30  ;;  %p108_p13 = scmp.lt.s32.totalorder %s102_s30, %s102_s30 }
  0x1c   :  { %p109_p0 = por %p108_p13, %p107_p12 }
  0x1e   :  { %p110_p1 = pnand %p109_p0, %p103_p11 }
  0x20   :  { %113 = shalt.err (!%p110_p1)
}
  0x21   :  { %29 = dma.hbm_to_vmem [thread:$0]  %s197_s1, 128, %s27_s12, [#allocation6]  }
  0x22   :  { %136 = dma.done.wait [#allocation3], 128  }
  0x23   :  { %137 = vsyncadd [#allocation3], 4294967168 }
  0x24   :  { %138 = dma.done.wait [#allocation6], 128  }
  0x25   :  { %139 = vsyncadd [#allocation6], 4294967168  ;;  %v36_v0 = vld [vmem:[#allocation2] sm:$0xff]  ;;  %v37_v8 = vld [vmem:[#allocation5] sm:$0xff]  ;;  %s144_s4 = smov [#allocation7]  }
  0x26   :  { %v38_v1 = vsub.f32 0.9, %v36_v0  ;;  %v66_v2 = vadd.f32 -0.1, %v36_v0  ;;  %s56_s5 = sshll.u32 %s144_s4, 4  ;;  %s57_s5 = int_to_ptr.vmem [resolvable:$true] %s56_s5 }
  0x27   :  { %s114_s1 = scalar_lea.vmem %s57_s5, 128  ;;  %p119_p3 = scmp.lt.s32.totalorder %s57_s5, %s57_s5 }
  0x28   :  { %v39_v3 = vmax.f32 %v38_v1, 0.0  ;;  %v42_v4 = vmax.f32 %v66_v2, 0.0  ;;  %p115_p2 = scmp.ne.s32.totalorder %s57_s5, %s114_s1  ;;  %p120_p4 = scmp.lt.s32.totalorder %s114_s1, %s114_s1 }
  0x2a   :  { %v40_v5 = vmul.f32 %v39_v3, %v39_v3  ;;  %v43_v6 = vmul.f32 0.5, %v42_v4  ;;  %p121_p5 = por %p120_p4, %p119_p3 }
  0x2c   :  { %v44_v7 = vmul.f32 %v43_v6, %v42_v4  ;;  %p122_p6 = pnand %p121_p5, %p115_p2 }
  0x2e   :  { %v45_v9 = vsub.f32 %v40_v5, %v44_v7 }
  0x30   :  { %v46_v10 = vmul.f32 %v45_v9, %v37_v8 }
  0x32   :  { %v47_v11 = vadd.f32 %v46_v10, %v44_v7 }
  0x34   :  { %49 = vst [vmem:[#allocation7] sm:$0xff] %v47_v11 }
  0x35   :  { %125 = shalt.err (!%p122_p6)
}
  0x36   :  { %s126_s8 = scalar_lea.hbm %s198_s2, 128 }
  0x37   :  { %p127_p7 = scmp.ne.s32.totalorder %s198_s2, %s126_s8  ;;  %p130_p8 = scmp.lt.u32.totalorder %s126_s8, %s198_s2 }
  0x39   :  { %p132_p9 = pnand %p130_p8, %p127_p7 }
  0x3b   :  { %135 = shalt.err (!%p132_p9)
}
  0x3c   :  { %59 = dma.vmem_to_hbm [thread:$0]  %s57_s5, 128, %s198_s2, [#allocation4]  }
  0x3d   :  { %140 = dma.done.wait [#allocation4], 128  }
  0x3e   :  { %141 = vsyncadd [#allocation4], 4294967168 }
  0x3f   :  { %63 = vsyncpa [#allocation3], 1 }
  0x40   :  { %64 = vsyncpa [#allocation6], 1 }
  0x41   :  { %65 = vsyncpa [#allocation4], 1 }

</bundles_post_ra>
